<compile_context>
chip_gen: v7x
topology: tpu7x:2x2x1
jax: 0.10.0
libtpu: 0.0.40
codegen_flags: <defaults>
</compile_context>

<pallas_src>
import functools

import jax
import jax.numpy as jnp
from jax.experimental import pallas as pl
from jax.experimental.pallas import tpu as pltpu


def glu_kernel(x_ref, w_ref, b_ref, o_ref, *, c2):
    x = x_ref[...]
    # One fused MXU matmul with f32 accumulation: y = x @ [W_s | W_g] + [b_s | b_g]
    y = jnp.dot(x, w_ref[...], preferred_element_type=jnp.float32) + b_ref[...]
    s_lin = y[:, :c2]
    g_lin = y[:, c2:]
    # sigmoid(s) = 1 / (1 + exp(-s)); exp + approx reciprocal issue on the EUP,
    # keeping the gate epilogue off the VALU critical path.
    sig = pl.reciprocal(1.0 + jnp.exp(-s_lin), approx=True)
    out = sig * jnp.maximum(g_lin, 0.0)
    o_ref[...] = out.astype(o_ref.dtype)


def _pick_block_b(B, c1, c2, itemsize):
    """Largest batch tile (<=512) that fits a conservative ~24 MiB VMEM budget."""
    if B <= 512:
        return B  # full-extent block is always legal; single grid step
    budget = 24 * 1024 * 1024
    w_bytes = c1 * (2 * c2) * itemsize                 # resident fused weight (1 buffer)
    # Per batch-row: double-buffered x / out tiles + f32 intermediates (y + slices).
    per_row = 2 * c1 * itemsize + 2 * c2 * itemsize + 6 * c2 * 4
    bb = 512
    while bb > 8 and w_bytes + bb * per_row > budget:
        bb //= 2
    return bb
    # TODO(synk): if the fused weight alone exceeds ~24 MiB (large c1*c2 on v7x),
    # add a second grid axis over c2 and stream per-N weight slices instead.


def _build_glu_call(B, c1, c2, out_dtype, itemsize, block_b, single_buffer_weights):
    resident_kwargs = (
        dict(pipeline_mode=pl.Buffered(1)) if single_buffer_weights else {}
    )
    cost = pl.CostEstimate(
        flops=2 * B * c1 * (2 * c2),
        transcendentals=B * c2,
        bytes_accessed=(B * c1 + c1 * 2 * c2 + 2 * c2 + B * c2) * itemsize,
    )
    return pl.pallas_call(
        functools.partial(glu_kernel, c2=c2),
        out_shape=jax.ShapeDtypeStruct((B, c2), out_dtype),
        grid_spec=pltpu.PrefetchScalarGridSpec(
            num_scalar_prefetch=0,
            grid=(pl.cdiv(B, block_b),),
            in_specs=[
                pl.BlockSpec((block_b, c1), lambda i: (i, 0)),                     # x tile
                pl.BlockSpec((c1, 2 * c2), lambda i: (0, 0), **resident_kwargs),   # fused W
                pl.BlockSpec((1, 2 * c2), lambda i: (0, 0), **resident_kwargs),    # fused b
            ],
            out_specs=pl.BlockSpec((block_b, c2), lambda i: (i, 0)),
        ),
        compiler_params=pltpu.CompilerParams(
            # Batch axis is parallel -> grid steps shard across the 2 TCs on v7x.
            dimension_semantics=("parallel",),
        ),
        cost_estimate=cost,
    )


def glu_forward(x, w_s, b_s, w_g, b_g, *, block_b=None):
    """x: (B, c1); w_*: (c1, c2) (pre-transposed vs. PyTorch); b_*: (c2,)."""
    B, c1 = x.shape
    c2 = w_s.shape[1]
    itemsize = jnp.dtype(x.dtype).itemsize
    if block_b is None:
        block_b = _pick_block_b(B, c1, c2, itemsize)

    # Fuse the two projections: one (c1, 2*c2) weight, one (1, 2*c2) bias.
    w_sg = jnp.concatenate([w_s, w_g], axis=1)
    b_sg = jnp.concatenate([b_s, b_g]).reshape(1, 2 * c2)

    try:
        call = _build_glu_call(B, c1, c2, x.dtype, itemsize, block_b,
                               single_buffer_weights=True)
        return call(x, w_sg, b_sg)
    except Exception:
        # Fallback if single-buffering via pipeline_mode is unsupported here.
        call = _build_glu_call(B, c1, c2, x.dtype, itemsize, block_b,
                               single_buffer_weights=False)
        return call(x, w_sg, b_sg)


def init_glu_params(key, c1, c2, dtype=jnp.float32):
    """Deterministic PyTorch-style Linear init: U(-1/sqrt(c1), 1/sqrt(c1))."""
    ks = jax.random.split(key, 4)
    bound = 1.0 / (c1 ** 0.5)
    # PyTorch stores weight as (c2, c1); we keep it transposed as (c1, c2).
    w_s = jax.random.uniform(ks[0], (c1, c2), dtype, -bound, bound)
    b_s = jax.random.uniform(ks[1], (c2,), dtype, -bound, bound)
    w_g = jax.random.uniform(ks[2], (c1, c2), dtype, -bound, bound)
    b_g = jax.random.uniform(ks[3], (c2,), dtype, -bound, bound)
    return w_s, b_s, w_g, b_g


if __name__ == "__main__":
    key = jax.random.PRNGKey(0)
    k_x, k_p = jax.random.split(key)

    B, c1, c2 = 8, 32, 64
    x = jax.random.normal(k_x, (B, c1), jnp.float32)
    w_s, b_s, w_g, b_g = init_glu_params(k_p, c1, c2)

    out = glu_forward(x, w_s, b_s, w_g, b_g)
    out = jax.block_until_ready(out)

    # Pure-JAX reference check of forward semantics.
    s_ref = jax.nn.sigmoid(x @ w_s + b_s)
    g_ref = jnp.maximum(x @ w_g + b_g, 0.0)
    ref = s_ref * g_ref
    assert out.shape == (B, c2)
    # Approx reciprocal in the sigmoid epilogue -> slightly looser tolerance.
    err = float(jnp.max(jnp.abs(out - ref)))
    assert jnp.allclose(out, ref, atol=2e-3, rtol=2e-3), err

    print("KERNEL_OK")
</pallas_src>

<mosaic_0001>
module attributes {stable_mosaic.version = 11 : i64} {
  func.func @glu_kernel(%arg0: i32, %arg1: memref<8x32xf32, #tpu.memory_space<vmem>>, %arg2: memref<32x128xf32, #tpu.memory_space<vmem>>, %arg3: memref<1x128xf32, #tpu.memory_space<vmem>>, %arg4: memref<8x64xf32, #tpu.memory_space<vmem>>) attributes {dimension_semantics = [#tpu.dimension_semantics<parallel>], iteration_bounds = array<i64: 1>, scalar_prefetch = 0 : i64, scratch_operands = 0 : i64, tpu.core_type = #tpu.core_type<tc>, window_params = [{transform_indices = @transform_0, window_bounds = array<i64: 8, 32>}, {pipeline_mode = #tpu.pipeline_mode<synchronous>, transform_indices = @transform_1, window_bounds = array<i64: 32, 128>}, {pipeline_mode = #tpu.pipeline_mode<synchronous>, transform_indices = @transform_2, window_bounds = array<i64: 1, 128>}, {transform_indices = @transform_3, window_bounds = array<i64: 8, 64>}]} {
    %c0 = arith.constant 0 : index
    %c0_0 = arith.constant 0 : index
    %0 = vector.load %arg1[%c0, %c0_0] : memref<8x32xf32, #tpu.memory_space<vmem>>, vector<8x32xf32>
    %c0_1 = arith.constant 0 : index
    %c0_2 = arith.constant 0 : index
    %1 = vector.load %arg2[%c0_1, %c0_2] : memref<32x128xf32, #tpu.memory_space<vmem>>, vector<32x128xf32>
    %cst = arith.constant dense<0.000000e+00> : vector<8x128xf32>
    %2 = tpu.matmul %0, %1, %cst {dimension_numbers = #tpu.dot_dimension_numbers<[1], [0], [0], [1], [0, 0, 1, 1], [], []>} : vector<8x32xf32>, vector<32x128xf32>, vector<8x128xf32> -> vector<8x128xf32>
    %c0_3 = arith.constant 0 : index
    %c0_4 = arith.constant 0 : index
    %3 = vector.load %arg3[%c0_3, %c0_4] : memref<1x128xf32, #tpu.memory_space<vmem>>, vector<1x128xf32>
    %4 = vector.broadcast %3 : vector<1x128xf32> to vector<8x128xf32>
    %5 = arith.addf %2, %4 : vector<8x128xf32>
    %6 = vector.extract_strided_slice %5 {offsets = [0, 0], sizes = [8, 64], strides = [1, 1]} : vector<8x128xf32> to vector<8x64xf32>
    %7 = vector.extract_strided_slice %5 {offsets = [0, 64], sizes = [8, 64], strides = [1, 1]} : vector<8x128xf32> to vector<8x64xf32>
    %cst_5 = arith.constant 0.000000e+00 : f32
    %8 = vector.broadcast %cst_5 : f32 to vector<8x64xf32>
    %9 = arith.subf %8, %6 : vector<8x64xf32>
    %10 = math.exp %9 : vector<8x64xf32>
    %cst_6 = arith.constant 1.000000e+00 : f32
    %11 = vector.broadcast %cst_6 : f32 to vector<8x64xf32>
    %12 = arith.addf %11, %10 : vector<8x64xf32>
    %13 = tpu.reciprocal %12 {approx = true} : vector<8x64xf32> -> vector<8x64xf32>
    %cst_7 = arith.constant 0.000000e+00 : f32
    %14 = vector.broadcast %cst_7 : f32 to vector<8x64xf32>
    %15 = arith.maximumf %7, %14 : vector<8x64xf32>
    %16 = arith.mulf %13, %15 : vector<8x64xf32>
    %c0_8 = arith.constant 0 : index
    %c0_9 = arith.constant 0 : index
    %17 = vector.load %arg4[%c0_8, %c0_9] : memref<8x64xf32, #tpu.memory_space<vmem>>, vector<8x64xf32>
    tpu.vector_store %arg4[%c0_8, %c0_9], %16 {strides = array<i32>} : memref<8x64xf32, #tpu.memory_space<vmem>>, vector<8x64xf32>,
    return
  }
  func.func @transform_0(%arg0: i32) -> (i32, i32) {
    %c0_i32 = arith.constant 0 : i32
    %c0_i32_0 = arith.constant 0 : i32
    return %arg0, %c0_i32 : i32, i32
  }
  func.func @transform_1(%arg0: i32) -> (i32, i32) {
    %c0_i32 = arith.constant 0 : i32
    %c0_i32_0 = arith.constant 0 : i32
    %c0_i32_1 = arith.constant 0 : i32
    return %c0_i32, %c0_i32_0 : i32, i32
  }
  func.func @transform_2(%arg0: i32) -> (i32, i32) {
    %c0_i32 = arith.constant 0 : i32
    %c0_i32_0 = arith.constant 0 : i32
    %c0_i32_1 = arith.constant 0 : i32
    return %c0_i32, %c0_i32_0 : i32, i32
  }
  func.func @transform_3(%arg0: i32) -> (i32, i32) {
    %c0_i32 = arith.constant 0 : i32
    %c0_i32_0 = arith.constant 0 : i32
    return %arg0, %c0_i32 : i32, i32
  }
}

module attributes {stable_mosaic.version = 11 : i64} {
  func.func @glu_kernel(%arg0: i32, %arg1: memref<8x32xf32, #tpu.memory_space<vmem>>, %arg2: memref<32x128xf32, #tpu.memory_space<vmem>>, %arg3: memref<1x128xf32, #tpu.memory_space<vmem>>, %arg4: memref<8x64xf32, #tpu.memory_space<vmem>>) attributes {dimension_semantics = [#tpu.dimension_semantics<parallel>], iteration_bounds = array<i64: 1>, scalar_prefetch = 0 : i64, scratch_operands = 0 : i64, tpu.core_type = #tpu.core_type<tc>, window_params = [{transform_indices = @transform_0, window_bounds = array<i64: 8, 32>}, {pipeline_mode = #tpu.pipeline_mode<synchronous>, transform_indices = @transform_1, window_bounds = array<i64: 32, 128>}, {pipeline_mode = #tpu.pipeline_mode<synchronous>, transform_indices = @transform_2, window_bounds = array<i64: 1, 128>}, {transform_indices = @transform_3, window_bounds = array<i64: 8, 64>}]} {
    %c0 = arith.constant 0 : index
    %c0_0 = arith.constant 0 : index
    %0 = vector.load %arg1[%c0, %c0_0] : memref<8x32xf32, #tpu.memory_space<vmem>>, vector<8x32xf32>
    %c0_1 = arith.constant 0 : index
    %c0_2 = arith.constant 0 : index
    %1 = vector.load %arg2[%c0_1, %c0_2] : memref<32x128xf32, #tpu.memory_space<vmem>>, vector<32x128xf32>
    %cst = arith.constant dense<0.000000e+00> : vector<8x128xf32>
    %2 = tpu.matmul %0, %1, %cst {dimension_numbers = #tpu.dot_dimension_numbers<[1], [0], [0], [1], [0, 0, 1, 1], [], []>} : vector<8x32xf32>, vector<32x128xf32>, vector<8x128xf32> -> vector<8x128xf32>
    %c0_3 = arith.constant 0 : index
    %c0_4 = arith.constant 0 : index
    %3 = vector.load %arg3[%c0_3, %c0_4] : memref<1x128xf32, #tpu.memory_space<vmem>>, vector<1x128xf32>
    %4 = vector.broadcast %3 : vector<1x128xf32> to vector<8x128xf32>
    %5 = arith.addf %2, %4 : vector<8x128xf32>
    %6 = vector.extract_strided_slice %5 {offsets = [0, 0], sizes = [8, 64], strides = [1, 1]} : vector<8x128xf32> to vector<8x64xf32>
    %7 = vector.extract_strided_slice %5 {offsets = [0, 64], sizes = [8, 64], strides = [1, 1]} : vector<8x128xf32> to vector<8x64xf32>
    %cst_5 = arith.constant 0.000000e+00 : f32
    %8 = vector.broadcast %cst_5 : f32 to vector<8x64xf32>
    %9 = arith.subf %8, %6 : vector<8x64xf32>
    %10 = math.exp %9 : vector<8x64xf32>
    %cst_6 = arith.constant 1.000000e+00 : f32
    %11 = vector.broadcast %cst_6 : f32 to vector<8x64xf32>
    %12 = arith.addf %11, %10 : vector<8x64xf32>
    %13 = tpu.reciprocal %12 {approx = true} : vector<8x64xf32> -> vector<8x64xf32>
    %cst_7 = arith.constant 0.000000e+00 : f32
    %14 = vector.broadcast %cst_7 : f32 to vector<8x64xf32>
    %15 = arith.maximumf %7, %14 : vector<8x64xf32>
    %16 = arith.mulf %13, %15 : vector<8x64xf32>
    %c0_8 = arith.constant 0 : index
    %c0_9 = arith.constant 0 : index
    %17 = vector.load %arg4[%c0_8, %c0_9] : memref<8x64xf32, #tpu.memory_space<vmem>>, vector<8x64xf32>
    tpu.vector_store %arg4[%c0_8, %c0_9], %16 {strides = array<i32>} : memref<8x64xf32, #tpu.memory_space<vmem>>, vector<8x64xf32>,
    return
  }
  func.func @transform_0(%arg0: i32) -> (i32, i32) {
    %c0_i32 = arith.constant 0 : i32
    %c0_i32_0 = arith.constant 0 : i32
    return %arg0, %c0_i32 : i32, i32
  }
  func.func @transform_1(%arg0: i32) -> (i32, i32) {
    %c0_i32 = arith.constant 0 : i32
    %c0_i32_0 = arith.constant 0 : i32
    %c0_i32_1 = arith.constant 0 : i32
    return %c0_i32, %c0_i32_0 : i32, i32
  }
  func.func @transform_2(%arg0: i32) -> (i32, i32) {
    %c0_i32 = arith.constant 0 : i32
    %c0_i32_0 = arith.constant 0 : i32
    %c0_i32_1 = arith.constant 0 : i32
    return %c0_i32, %c0_i32_0 : i32, i32
  }
  func.func @transform_3(%arg0: i32) -> (i32, i32) {
    %c0_i32 = arith.constant 0 : i32
    %c0_i32_0 = arith.constant 0 : i32
    return %arg0, %c0_i32 : i32, i32
  }
}

</mosaic_0001>

<bundles_post_ra>
// kernel: tpu_custom_call.1
= control target key start
LH: loop header
LB: loop body
LE: loop exit
PB: predicated region body
PF: predicated region fallthrough
CT: control target
= control target key end

     0   :  { %8 = vsyncpa [#allocation3], 0  ;;  %s340_s0 = inlined_call_operand.hbm [shape: f32[8,32], index: 0, kind: input, shape index: {}]   ;;  %s341_s1 = inlined_call_operand.hbm [shape: f32[32,128], index: 1, kind: input, shape index: {}]   ;;  %s342_s2 = inlined_call_operand.vmem [shape: f32[1,128], index: 2, kind: input, shape index: {}]   ;;  %s343_s3 = inlined_call_operand.hbm [shape: f32[8,64], index: 3, kind: output, shape index: {}]  }
   0x1   :  { %9 = vsyncpa [#allocation6], 0 }
   0x2   :  { %10 = vsyncpa [#allocation4], 0  ;;  %s265_s12 = smov [#allocation2]   ;;  %s266_s14 = smov [#allocation5]  }
   0x3   :  { %s17_s13 = sshll.u32 %s265_s12, 4  ;;  %s26_s15 = sshll.u32 %s266_s14, 4  ;;  %s18_s13 = int_to_ptr.vmem [resolvable:$true] %s17_s13  ;;  %s294_s15 = int_to_ptr.vmem [resolvable:$true] %s26_s15 }
   0x4   :  { %s193_s18 = scalar_lea.hbm %s340_s0, 128 }
   0x5   :  { %p194_p0 = scmp.ne.s32.totalorder %s340_s0, %s193_s18  ;;  %p197_p1 = scmp.lt.u32.totalorder %s193_s18, %s340_s0 }
   0x7   :  { %p199_p2 = pnand %p197_p1, %p194_p0 }
   0x9   :  { %202 = shalt.err (!%p199_p2)
}
   0xa   :  { %s203_s23 = scalar_lea.vmem %s18_s13, 128  ;;  %p208_p4 = scmp.lt.s32.totalorder %s18_s13, %s18_s13 }
   0xb   :  { %p204_p3 = scmp.ne.s32.totalorder %s18_s13, %s203_s23  ;;  %p209_p5 = scmp.lt.s32.totalorder %s203_s23, %s203_s23 }
   0xd   :  { %p210_p6 = por %p209_p5, %p208_p4 }
   0xf   :  { %p211_p7 = pnand %p210_p6, %p204_p3 }
  0x11   :  { %214 = shalt.err (!%p211_p7)
}
  0x12   :  { %20 = dma.hbm_to_vmem [thread:$0]  %s340_s0, 128, %s18_s13, [#allocation3]  }
  0x13   :  { %s215_s28 = scalar_lea.hbm %s341_s1, 512 }
  0x14   :  { %p216_p8 = scmp.ne.s32.totalorder %s341_s1, %s215_s28  ;;  %p219_p9 = scmp.lt.u32.totalorder %s215_s28, %s341_s1 }
  0x16   :  { %p221_p10 = pnand %p219_p9, %p216_p8 }
  0x18   :  { %224 = shalt.err (!%p221_p10)
}
  0x19   :  { %s225_s6 = scalar_lea.vmem %s294_s15, 512  ;;  %p230_p12 = scmp.lt.s32.totalorder %s294_s15, %s294_s15 }
  0x1a   :  { %p226_p11 = scmp.ne.s32.totalorder %s294_s15, %s225_s6  ;;  %p231_p13 = scmp.lt.s32.totalorder %s225_s6, %s225_s6 }
  0x1c   :  { %p232_p0 = por %p231_p13, %p230_p12 }
  0x1e   :  { %p233_p1 = pnand %p232_p0, %p226_p11 }
  0x20   :  { %236 = shalt.err (!%p233_p1)
}
  0x21   :  { %s267_s0 = smov 128   ;;  %s268_s7 = smov 8  }
  0x22   :  { %32 = dma.hbm_to_vmem [thread:$0]  %s341_s1, 512, %s294_s15, [#allocation6], %s267_s0, %s267_s0, %s268_s7  }
  0x23   :  { %259 = dma.done.wait [#allocation3], 128  }
  0x24   :  { %260 = vsyncadd [#allocation3], 4294967168 }
  0x25   :  { %261 = dma.done.wait [#allocation6], 512  }
  0x26   :  { %262 = vsyncadd [#allocation6], 4294966784  ;;  %v269_v0 = vmov 0.0|0.0   ;;  %vm270_vm0 = vmmov 0   ;;  %v271_v1 = vmov 0.0   ;;  %v42_v2 = vld [vmem:[#allocation5] sm:$0xff] }
  0x27   :  { %174 = vmatprep.subr.bf16.mxu0 %v269_v0  ;;  %171 = vmatprep.mubr.msk.f32.mxu0 %vm270_vm0, %v271_v1  ;;  %v43_v3 = vld [vmem:[#allocation5 + $0x8] sm:$0xff]  ;;  %v44_v4 = vld [vmem:[#allocation5 + $0x10] sm:$0xff]  ;;  %v45_v6 = vld [vmem:[#allocation5 + $0x18] sm:$0xff]  ;;  %vm53_vm1 = vcmask 261120   ;;  %s272_s11 = smov 64   ;;  %s273_s12 = smov [#allocation7]  }
  0x28   :  { %v175_v5 = vpack.c.bf16 %v43_v3, %v42_v2  ;;  %v178_v7 = vpack.c.bf16 %v45_v6, %v44_v4  ;;  %v41_v8 = vld [vmem:[#allocation2] sm:$0xff]  ;;  %s146_s13 = sshll.u32 %s273_s12, 4  ;;  %vm138_vm2 = vcmask 523264   ;;  %s147_s13 = int_to_ptr.vmem [resolvable:$true] %s146_s13 }
  0x29   :  { %v156_v9 = vld [vmem:[%s342_s2] ss:$0 sm:$0xff]  ;;  %s237_s2 = scalar_lea.vmem %s147_s13, 128  ;;  %p242_p3 = scmp.lt.s32.totalorder %s147_s13, %s147_s13 }
  0x2a   :  { %176 = vmatpush3.bf16.msra.mxu0 %v175_v5  ;;  %p238_p2 = scmp.ne.s32.totalorder %s147_s13, %s237_s2  ;;  %p243_p4 = scmp.lt.s32.totalorder %s237_s2, %s237_s2 }
  0x2b   :  { %177 = vmatprep.subr.bf16.mxu0 %v269_v0 }
  0x2c   :  { %p244_p5 = por %p243_p4, %p242_p3 }
  0x2e   :  { %179 = vmatpush3.bf16.msra.mxu0 %v178_v7  ;;  %p245_p6 = pnand %p244_p5, %p238_p2 }
  0x31   :  { %172 = vmatmul.mubr.msk.f32.vlgmr.msra.gmra.mrb[0].mxu0 %vm53_vm1, %v41_v8 }
 0x104   :  { %v123_v10 = vpop.f32.mrb[0].mxu0 }
 0x105   :  { %v124_v11 = vadd.f32 %v156_v9, %v123_v10  ;;  %v173_v12 = vpop.f32.mrb[1].mxu0 }
 0x107   :  { %v132_v13 = vmax.f32 %v124_v11, 0.0  ;;  %v127_v14 = vsub.f32 0.0, %v124_v11 }
 0x109   :  { %134 = vrot.lane.b32.xlu0 %v132_v13, %s272_s11  ;;  %v128_v15 = vmul.f32 1.442695, %v127_v14 }
 0x10b   :  { %189 = vpow2.f32 %v128_v15 }
 0x115   :  { %v190_v16 = vpop.eup %189 }
 0x116   :  { %v130_v17 = vadd.f32 1.0, %v190_v16 }
 0x118   :  { %191 = vrcp.f32 %v130_v17 }
 0x122   :  { %v192_v18 = vpop.eup %191 }
 0x17b   :  { %v135_v19 = vpop.permute.xlu0 %134 }
 0x17c   :  { %v137_v20 = vmul.f32 %v192_v18, %v135_v19 }
 0x17e   :  { %139 = vst.msk [vmem:[#allocation7] sm:$0xff] %vm138_vm2, %v137_v20 }
 0x17f   :  { %248 = shalt.err (!%p245_p6)
}
 0x180   :  { %s249_s16 = scalar_lea.hbm %s343_s3, 128 }
 0x181   :  { %p250_p7 = scmp.ne.s32.totalorder %s343_s3, %s249_s16  ;;  %p253_p8 = scmp.lt.u32.totalorder %s249_s16, %s343_s3 }
 0x183   :  { %p255_p9 = pnand %p253_p8, %p250_p7 }
 0x185   :  { %258 = shalt.err (!%p255_p9)
}
 0x186   :  { %149 = dma.vmem_to_hbm [thread:$0]  %s147_s13, 128, %s343_s3, [#allocation4]  }
 0x187   :  { %263 = dma.done.wait [#allocation4], 128  }
 0x188   :  { %264 = vsyncadd [#allocation4], 4294967168 }
 0x189   :  { %153 = vsyncpa [#allocation3], 1 }
 0x18a   :  { %154 = vsyncpa [#allocation6], 1 }
 0x18b   :  { %155 = vsyncpa [#allocation4], 1 }

// kernel: tpu_custom_call.1
= control target key start
LH: loop header
LB: loop body
LE: loop exit
PB: predicated region body
PF: predicated region fallthrough
CT: control target
= control target key end

     0   :  { %8 = vsyncpa [#allocation3], 0  ;;  %s340_s0 = inlined_call_operand.hbm [shape: f32[8,32], index: 0, kind: input, shape index: {}]   ;;  %s341_s1 = inlined_call_operand.hbm [shape: f32[32,128], index: 1, kind: input, shape index: {}]   ;;  %s342_s2 = inlined_call_operand.vmem [shape: f32[1,128], index: 2, kind: input, shape index: {}]   ;;  %s343_s3 = inlined_call_operand.hbm [shape: f32[8,64], index: 3, kind: output, shape index: {}]  }
   0x1   :  { %9 = vsyncpa [#allocation6], 0 }
   0x2   :  { %10 = vsyncpa [#allocation4], 0  ;;  %s265_s12 = smov [#allocation2]   ;;  %s266_s14 = smov [#allocation5]  }
   0x3   :  { %s17_s13 = sshll.u32 %s265_s12, 4  ;;  %s26_s15 = sshll.u32 %s266_s14, 4  ;;  %s18_s13 = int_to_ptr.vmem [resolvable:$true] %s17_s13  ;;  %s294_s15 = int_to_ptr.vmem [resolvable:$true] %s26_s15 }
   0x4   :  { %s193_s18 = scalar_lea.hbm %s340_s0, 128 }
   0x5   :  { %p194_p0 = scmp.ne.s32.totalorder %s340_s0, %s193_s18  ;;  %p197_p1 = scmp.lt.u32.totalorder %s193_s18, %s340_s0 }
   0x7   :  { %p199_p2 = pnand %p197_p1, %p194_p0 }
   0x9   :  { %202 = shalt.err (!%p199_p2)
}
   0xa   :  { %s203_s23 = scalar_lea.vmem %s18_s13, 128  ;;  %p208_p4 = scmp.lt.s32.totalorder %s18_s13, %s18_s13 }
   0xb   :  { %p204_p3 = scmp.ne.s32.totalorder %s18_s13, %s203_s23  ;;  %p209_p5 = scmp.lt.s32.totalorder %s203_s23, %s203_s23 }
   0xd   :  { %p210_p6 = por %p209_p5, %p208_p4 }
   0xf   :  { %p211_p7 = pnand %p210_p6, %p204_p3 }
  0x11   :  { %214 = shalt.err (!%p211_p7)
}
  0x12   :  { %20 = dma.hbm_to_vmem [thread:$0]  %s340_s0, 128, %s18_s13, [#allocation3]  }
  0x13   :  { %s215_s28 = scalar_lea.hbm %s341_s1, 512 }
  0x14   :  { %p216_p8 = scmp.ne.s32.totalorder %s341_s1, %s215_s28  ;;  %p219_p9 = scmp.lt.u32.totalorder %s215_s28, %s341_s1 }
  0x16   :  { %p221_p10 = pnand %p219_p9, %p216_p8 }
  0x18   :  { %224 = shalt.err (!%p221_p10)
}
  0x19   :  { %s225_s6 = scalar_lea.vmem %s294_s15, 512  ;;  %p230_p12 = scmp.lt.s32.totalorder %s294_s15, %s294_s15 }
  0x1a   :  { %p226_p11 = scmp.ne.s32.totalorder %s294_s15, %s225_s6  ;;  %p231_p13 = scmp.lt.s32.totalorder %s225_s6, %s225_s6 }
  0x1c   :  { %p232_p0 = por %p231_p13, %p230_p12 }
  0x1e   :  { %p233_p1 = pnand %p232_p0, %p226_p11 }
  0x20   :  { %236 = shalt.err (!%p233_p1)
}
  0x21   :  { %s267_s0 = smov 128   ;;  %s268_s7 = smov 8  }
  0x22   :  { %32 = dma.hbm_to_vmem [thread:$0]  %s341_s1, 512, %s294_s15, [#allocation6], %s267_s0, %s267_s0, %s268_s7  }
  0x23   :  { %259 = dma.done.wait [#allocation3], 128  }
  0x24   :  { %260 = vsyncadd [#allocation3], 4294967168 }
  0x25   :  { %261 = dma.done.wait [#allocation6], 512  }
  0x26   :  { %262 = vsyncadd [#allocation6], 4294966784  ;;  %v269_v0 = vmov 0.0|0.0   ;;  %vm270_vm0 = vmmov 0   ;;  %v271_v1 = vmov 0.0   ;;  %v42_v2 = vld [vmem:[#allocation5] sm:$0xff] }
  0x27   :  { %174 = vmatprep.subr.bf16.mxu0 %v269_v0  ;;  %171 = vmatprep.mubr.msk.f32.mxu0 %vm270_vm0, %v271_v1  ;;  %v43_v3 = vld [vmem:[#allocation5 + $0x8] sm:$0xff]  ;;  %v44_v4 = vld [vmem:[#allocation5 + $0x10] sm:$0xff]  ;;  %v45_v6 = vld [vmem:[#allocation5 + $0x18] sm:$0xff]  ;;  %vm53_vm1 = vcmask 261120   ;;  %s272_s11 = smov 64   ;;  %s273_s12 = smov [#allocation7]  }
  0x28   :  { %v175_v5 = vpack.c.bf16 %v43_v3, %v42_v2  ;;  %v178_v7 = vpack.c.bf16 %v45_v6, %v44_v4  ;;  %v41_v8 = vld [vmem:[#allocation2] sm:$0xff]  ;;  %s146_s13 = sshll.u32 %s273_s12, 4  ;;  %vm138_vm2 = vcmask 523264   ;;  %s147_s13 = int_to_ptr.vmem [resolvable:$true] %s146_s13 }
  0x29   :  { %v156_v9 = vld [vmem:[%s342_s2] ss:$0 sm:$0xff]  ;;  %s237_s2 = scalar_lea.vmem %s147_s13, 128  ;;  %p242_p3 = scmp.lt.s32.totalorder %s147_s13, %s147_s13 }
  0x2a   :  { %176 = vmatpush3.bf16.msra.mxu0 %v175_v5  ;;  %p238_p2 = scmp.ne.s32.totalorder %s147_s13, %s237_s2  ;;  %p243_p4 = scmp.lt.s32.totalorder %s237_s2, %s237_s2 }
  0x2b   :  { %177 = vmatprep.subr.bf16.mxu0 %v269_v0 }
  0x2c   :  { %p244_p5 = por %p243_p4, %p242_p3 }
  0x2e   :  { %179 = vmatpush3.bf16.msra.mxu0 %v178_v7  ;;  %p245_p6 = pnand %p244_p5, %p238_p2 }
  0x31   :  { %172 = vmatmul.mubr.msk.f32.vlgmr.msra.gmra.mrb[0].mxu0 %vm53_vm1, %v41_v8 }
 0x104   :  { %v123_v10 = vpop.f32.mrb[0].mxu0 }
 0x105   :  { %v124_v11 = vadd.f32 %v156_v9, %v123_v10  ;;  %v173_v12 = vpop.f32.mrb[1].mxu0 }
 0x107   :  { %v132_v13 = vmax.f32 %v124_v11, 0.0  ;;  %v127_v14 = vsub.f32 0.0, %v124_v11 }
 0x109   :  { %134 = vrot.lane.b32.xlu0 %v132_v13, %s272_s11  ;;  %v128_v15 = vmul.f32 1.442695, %v127_v14 }
 0x10b   :  { %189 = vpow2.f32 %v128_v15 }
 0x115   :  { %v190_v16 = vpop.eup %189 }
 0x116   :  { %v130_v17 = vadd.f32 1.0, %v190_v16 }
 0x118   :  { %191 = vrcp.f32 %v130_v17 }
 0x122   :  { %v192_v18 = vpop.eup %191 }
 0x17b   :  { %v135_v19 = vpop.permute.xlu0 %134 }
 0x17c   :  { %v137_v20 = vmul.f32 %v192_v18, %v135_v19 }
 0x17e   :  { %139 = vst.msk [vmem:[#allocation7] sm:$0xff] %vm138_vm2, %v137_v20 }
 0x17f   :  { %248 = shalt.err (!%p245_p6)
}
 0x180   :  { %s249_s16 = scalar_lea.hbm %s343_s3, 128 }
 0x181   :  { %p250_p7 = scmp.ne.s32.totalorder %s343_s3, %s249_s16  ;;  %p253_p8 = scmp.lt.u32.totalorder %s249_s16, %s343_s3 }
 0x183   :  { %p255_p9 = pnand %p253_p8, %p250_p7 }
 0x185   :  { %258 = shalt.err (!%p255_p9)
}
 0x186   :  { %149 = dma.vmem_to_hbm [thread:$0]  %s147_s13, 128, %s343_s3, [#allocation4]  }
 0x187   :  { %263 = dma.done.wait [#allocation4], 128  }
 0x188   :  { %264 = vsyncadd [#allocation4], 4294967168 }
 0x189   :  { %153 = vsyncpa [#allocation3], 1 }
 0x18a   :  { %154 = vsyncpa [#allocation6], 1 }
 0x18b   :  { %155 = vsyncpa [#allocation4], 1 }

</bundles_post_ra>
